<compile_context>
chip_gen: v7x
topology: tpu7x:2x2x1
jax: 0.10.0
libtpu: 0.0.40
codegen_flags: <defaults>
</compile_context>

<pallas_src>
import functools
import math
from typing import NamedTuple

import jax
import jax.numpy as jnp
from jax.experimental import pallas as pl
from jax.experimental.pallas import tpu as pltpu

_INV_SQRT2 = 1.0 / math.sqrt(2.0)
_LN_EPS = 1e-5


def _round_up(x, m):
    return ((x + m - 1) // m) * m


def _cdiv(a, b):
    return -(-a // b)


def _vmem_budget_bytes():
    """Generation-aware VMEM budget: <=80% of physical, capped at 100 MiB."""
    cap = None
    get_info = getattr(pltpu, "get_tpu_info", None)
    if get_info is not None:
        try:
            cap = getattr(get_info(), "vmem_capacity_bytes", None)
        except Exception:
            cap = None
    if not cap:
        cap = 64 * 1024 * 1024  # conservative default: v7x has 64 MiB per TensorCore
    return min(int(cap * 0.8), 100 * 1024 * 1024)


def _const_spec(block_shape, index_map, single_buffer):
    """BlockSpec with a grid-constant index map; single-buffered when supported."""
    buffered = getattr(pl, "Buffered", None)
    if single_buffer and buffered is not None:
        try:
            return pl.BlockSpec(block_shape, index_map, pipeline_mode=buffered(1))
        except TypeError:
            pass
    return pl.BlockSpec(block_shape, index_map)


class PreparedParams(NamedTuple):
    w1: jax.Array    # (Dp, Ep) bf16
    b1: jax.Array    # (1, Ep)  f32
    w2: jax.Array    # (Ep, Dp) bf16
    lnp: jax.Array   # (3, Dp)  f32 -- rows: [b2, ln_gamma, ln_beta]
    d: int           # true feature dim
    e: int           # true expanded dim


def prepare_params(w1, b1, w2, b2, gamma, beta):
    """Pad to lane-dense shapes and cast weights to bf16 ONCE (not per call)."""
    D, E = w1.shape
    Dp, Ep = _round_up(D, 128), _round_up(E, 128)
    w1p = jnp.pad(w1, ((0, Dp - D), (0, Ep - E))).astype(jnp.bfloat16)
    w2p = jnp.pad(w2, ((0, Ep - E), (0, Dp - D))).astype(jnp.bfloat16)
    b1p = jnp.pad(b1, (0, Ep - E)).reshape(1, Ep).astype(jnp.float32)
    lnp = jnp.stack([jnp.pad(b2, (0, Dp - D)),
                     jnp.pad(gamma, (0, Dp - D)),
                     jnp.pad(beta, (0, Dp - D))]).astype(jnp.float32)
    return PreparedParams(w1p, b1p, w2p, lnp, D, E)


def _ln_residual(y, x, lnp, inv_d, pad_cols):
    """LayerNorm (over true feature dim) + residual.  Padded columns of y are 0."""
    b2 = lnp[0:1, :]
    gamma = lnp[1:2, :]
    beta = lnp[2:3, :]
    y = y + b2
    mean = jnp.sum(y, axis=-1, keepdims=True) * inv_d       # padded cols are 0
    c = y - mean
    ssq = jnp.sum(c * c, axis=-1, keepdims=True)
    if pad_cols:
        # after centering, the (Dp - D) padded columns contribute (-mean)^2 each
        ssq = ssq - float(pad_cols) * mean * mean
    var = ssq * inv_d
    y_norm = c * jax.lax.rsqrt(var + _LN_EPS) * gamma + beta
    return y_norm + x


def _fe_resident_kernel(x_ref, w1_ref, b1_ref, w2_ref, lnp_ref, o_ref, *,
                        inv_d, pad_cols):
    """Weights fully VMEM-resident; grid = (row_tiles,)."""
    x = x_ref[...]                                           # (TM, Dp) f32 residual
    h = jnp.dot(x.astype(jnp.bfloat16), w1_ref[...],
                preferred_element_type=jnp.float32)
    h = h + b1_ref[...]
    # Exact-erf GELU (torch.nn.GELU default), f32 (correct on v5e/v6e/v7x).
    # TODO(synk): bf16 GELU on v6e/v7x would halve VALU work if tolerances allow.
    h = 0.5 * h * (1.0 + jax.lax.erf(h * _INV_SQRT2))
    # Dropout(p) is identity at inference.
    # TODO(synk): training-mode dropout (pltpu.prng_random_bits mask) not implemented.
    y = jnp.dot(h.astype(jnp.bfloat16), w2_ref[...],
                preferred_element_type=jnp.float32)
    o_ref[...] = _ln_residual(y, x, lnp_ref[...], inv_d, pad_cols).astype(o_ref.dtype)


def _fe_chunked_kernel(x_ref, w1_ref, b1_ref, w2_ref, lnp_ref, o_ref,
                       acc_ref, xbf_ref, *, inv_d, pad_cols):
    """E-chunked streaming fallback; grid = (row_tiles, e_chunks)."""
    e = pl.program_id(1)

    @pl.when(e == 0)
    def _():
        # hoist the x -> bf16 cast out of the E loop (x block is resident across e)
        xbf_ref[...] = x_ref[...].astype(jnp.bfloat16)

    h = jnp.dot(xbf_ref[...], w1_ref[...], preferred_element_type=jnp.float32)
    h = h + b1_ref[...]
    h = 0.5 * h * (1.0 + jax.lax.erf(h * _INV_SQRT2))
    partial = jnp.dot(h.astype(jnp.bfloat16), w2_ref[...],
                      preferred_element_type=jnp.float32)

    # direct write on the first chunk: no zero-init + load-add
    @pl.when(e == 0)
    def _():
        acc_ref[...] = partial

    @pl.when(e > 0)
    def _():
        acc_ref[...] += partial

    @pl.when(e == pl.num_programs(1) - 1)
    def _():
        x = x_ref[...]
        o_ref[...] = _ln_residual(acc_ref[...], x, lnp_ref[...],
                                  inv_d, pad_cols).astype(o_ref.dtype)


def feature_expansion(x, params: PreparedParams, *, row_tile=1024, e_tile=512,
                      force_chunked=False):
    """x: (B, S, D) f32; params from prepare_params().  Returns (B, S, D)."""
    B, S, D = x.shape
    assert D == params.d, "x feature dim does not match prepared params"
    Dp, Ep = params.w1.shape
    rows = B * S
    pad_cols = Dp - D
    inv_d = 1.0 / D

    budget = _vmem_budget_bytes()

    rows8 = _round_up(rows, 8)
    tm = min(_round_up(row_tile, 8), rows8)
    # v7x has 2 TensorCores: keep >=2 tiles on the parallel row axis when the
    # problem is large enough that splitting costs nothing.
    if _cdiv(rows8, tm) < 2 and tm >= 256:
        tm = _round_up(_cdiv(tm, 2), 8)

    def resident_fits(tm_, wbuf):
        io = 2 * (tm_ * Dp * 4) * 2            # x + out blocks, double-buffered f32
        weights = wbuf * 2 * (Dp * Ep * 2)     # W1 + W2 bf16
        interm = tm_ * Ep * (4 + 2)            # f32 GELU temp + its bf16 copy
        small = 8 * Ep * 4 + 8 * Dp * 4
        return io + weights + interm + small + (2 << 20) <= budget

    # Prefer fully VMEM-resident weights (weights DMA'd once per call instead of
    # once per row tile).  Conservatively assume double-buffered weights here.
    tm_res = tm
    while tm_res > 256 and not resident_fits(tm_res, 2):
        tm_res = max(256, _round_up(tm_res // 2, 8))
    use_resident = (not force_chunked) and resident_fits(tm_res, 2)

    te = None
    if use_resident:
        tm = tm_res
    else:
        # E-chunked fallback: shrink te (keeps MXU shape & weight reuse) before tm.
        te = min(_round_up(e_tile, 128), Ep)
        while Ep % te != 0:
            te -= 128

        def chunked_fits(tm_, te_):
            io = 2 * (tm_ * Dp * 4) * 2
            w = 2 * (Dp * te_ * 2 + te_ * Dp * 2)       # double-buffered W chunks
            scratch = tm_ * Dp * 4 + tm_ * Dp * 2       # f32 acc + bf16 x copy
            interm = tm_ * te_ * (4 + 2)
            small = 8 * te_ * 4 + 8 * Dp * 4
            return io + w + scratch + interm + small + (2 << 20) <= budget

        while te > 128 and not chunked_fits(tm, te):
            te -= 128
            while Ep % te != 0:
                te -= 128
        while tm > 8 and not chunked_fits(tm, te):
            tm = max(8, _round_up(tm // 2, 8))

    rows_p = _round_up(rows, tm)
    x2d = jnp.pad(x.reshape(rows, D), ((0, rows_p - rows), (0, Dp - D)))

    kern_kwargs = dict(inv_d=inv_d, pad_cols=pad_cols)

    if use_resident:
        def run(single_buffer):
            kernel = functools.partial(_fe_resident_kernel, **kern_kwargs)
            return pl.pallas_call(
                kernel,
                out_shape=jax.ShapeDtypeStruct((rows_p, Dp), x.dtype),
                grid_spec=pltpu.PrefetchScalarGridSpec(
                    num_scalar_prefetch=0,
                    grid=(rows_p // tm,),
                    in_specs=[
                        pl.BlockSpec((tm, Dp), lambda i: (i, 0)),                  # x rows
                        _const_spec((Dp, Ep), lambda i: (0, 0), single_buffer),    # W1 (resident)
                        _const_spec((1, Ep), lambda i: (0, 0), single_buffer),     # b1
                        _const_spec((Ep, Dp), lambda i: (0, 0), single_buffer),    # W2 (resident)
                        _const_spec((3, Dp), lambda i: (0, 0), single_buffer),     # b2/gamma/beta
                    ],
                    out_specs=pl.BlockSpec((tm, Dp), lambda i: (i, 0)),
                ),
                compiler_params=pltpu.CompilerParams(
                    dimension_semantics=("parallel",),
                    vmem_limit_bytes=budget),
            )(x2d, params.w1, params.b1, params.w2, params.lnp)

        try:
            out = run(single_buffer=True)
        except Exception:
            # pl.Buffered(1) pipeline_mode unsupported -> plain (double-buffered) specs
            out = run(single_buffer=False)
    else:
        kernel = functools.partial(_fe_chunked_kernel, **kern_kwargs)
        out = pl.pallas_call(
            kernel,
            out_shape=jax.ShapeDtypeStruct((rows_p, Dp), x.dtype),
            grid_spec=pltpu.PrefetchScalarGridSpec(
                num_scalar_prefetch=0,
                grid=(rows_p // tm, Ep // te),
                in_specs=[
                    pl.BlockSpec((tm, Dp), lambda i, e: (i, 0)),   # x rows
                    pl.BlockSpec((Dp, te), lambda i, e: (0, e)),   # W1 chunk (bf16)
                    pl.BlockSpec((1, te), lambda i, e: (0, e)),    # b1 chunk
                    pl.BlockSpec((te, Dp), lambda i, e: (e, 0)),   # W2 chunk (bf16)
                    pl.BlockSpec((3, Dp), lambda i, e: (0, 0)),    # b2/gamma/beta
                ],
                out_specs=pl.BlockSpec((tm, Dp), lambda i, e: (i, 0)),
                scratch_shapes=[pltpu.VMEM((tm, Dp), jnp.float32),    # f32 accumulator
                                pltpu.VMEM((tm, Dp), jnp.bfloat16)],  # hoisted bf16 x
            ),
            compiler_params=pltpu.CompilerParams(
                dimension_semantics=("parallel", "arbitrary"),
                vmem_limit_bytes=budget),
        )(x2d, params.w1, params.b1, params.w2, params.lnp)

    return out[:rows, :D].reshape(B, S, D)


def init_params(key, input_size, expansion_factor):
    """Deterministic synthetic parameters matching the module's shapes."""
    expanded = input_size * expansion_factor
    k1, k2, k3, k4 = jax.random.split(key, 4)
    bound1 = 1.0 / math.sqrt(input_size)
    bound2 = 1.0 / math.sqrt(expanded)
    w1 = jax.random.uniform(k1, (input_size, expanded), jnp.float32, -bound1, bound1)
    b1 = jax.random.uniform(k2, (expanded,), jnp.float32, -bound1, bound1)
    w2 = jax.random.uniform(k3, (expanded, input_size), jnp.float32, -bound2, bound2)
    b2 = jax.random.uniform(k4, (input_size,), jnp.float32, -bound2, bound2)
    gamma = jnp.ones((input_size,), jnp.float32)   # LayerNorm weight init
    beta = jnp.zeros((input_size,), jnp.float32)   # LayerNorm bias init
    return w1, b1, w2, b2, gamma, beta


def _reference(x, w1, b1, w2, b2, gamma, beta, *, bf16_matmul):
    dt = jnp.bfloat16 if bf16_matmul else x.dtype
    h = jnp.dot(x.astype(dt), w1.astype(dt), preferred_element_type=jnp.float32) + b1
    h = 0.5 * h * (1.0 + jax.lax.erf(h / math.sqrt(2.0)))
    y = jnp.dot(h.astype(dt), w2.astype(dt), preferred_element_type=jnp.float32) + b2
    mean = jnp.mean(y, axis=-1, keepdims=True)
    var = jnp.mean((y - mean) ** 2, axis=-1, keepdims=True)
    y = (y - mean) / jnp.sqrt(var + _LN_EPS) * gamma + beta
    return y + x


if __name__ == "__main__":
    # --- test 1: resident-weights fast path (batch=2, seq=8, input=32, factor=4) ---
    B, S, D, EF = 2, 8, 32, 4
    key = jax.random.PRNGKey(0)
    kx, kp = jax.random.split(key)
    x = jax.random.normal(kx, (B, S, D), jnp.float32)
    raw = init_params(kp, D, EF)
    params = prepare_params(*raw)

    out = feature_expansion(x, params)
    out = jax.block_until_ready(out)
    assert out.shape == (B, S, D)

    ref_bf16 = _reference(x, *raw, bf16_matmul=True)
    assert jnp.allclose(out, ref_bf16, atol=2e-3, rtol=2e-3), \
        "mismatch vs matched-precision reference (resident path)"
    ref_f32 = _reference(x, *raw, bf16_matmul=False)
    assert jnp.allclose(out, ref_f32, atol=1e-1, rtol=1e-1), \
        "diverges from f32 reference beyond bf16 matmul noise (resident path)"

    # --- test 2: E-chunked fallback path with >1 chunk (input=32, factor=8) ---
    D2, EF2 = 32, 8
    kx2, kp2 = jax.random.split(jax.random.PRNGKey(1))
    x2 = jax.random.normal(kx2, (B, S, D2), jnp.float32)
    raw2 = init_params(kp2, D2, EF2)
    params2 = prepare_params(*raw2)

    out2 = feature_expansion(x2, params2, force_chunked=True, e_tile=128)
    out2 = jax.block_until_ready(out2)
    ref2 = _reference(x2, *raw2, bf16_matmul=True)
    assert jnp.allclose(out2, ref2, atol=2e-3, rtol=2e-3), \
        "mismatch vs matched-precision reference (chunked path)"

    print("KERNEL_OK")
</pallas_src>

<mosaic_0001>
module attributes {stable_mosaic.version = 11 : i64} {
  func.func @_fe_resident_kernel(%arg0: i32, %arg1: memref<16x128xf32, #tpu.memory_space<vmem>>, %arg2: memref<128x128xbf16, #tpu.memory_space<vmem>>, %arg3: memref<1x128xf32, #tpu.memory_space<vmem>>, %arg4: memref<128x128xbf16, #tpu.memory_space<vmem>>, %arg5: memref<3x128xf32, #tpu.memory_space<vmem>>, %arg6: memref<16x128xf32, #tpu.memory_space<vmem>>) attributes {dimension_semantics = [#tpu.dimension_semantics<parallel>], iteration_bounds = array<i64: 1>, scalar_prefetch = 0 : i64, scratch_operands = 0 : i64, tpu.core_type = #tpu.core_type<tc>, window_params = [{transform_indices = @transform_0, window_bounds = array<i64: 16, 128>}, {pipeline_mode = #tpu.pipeline_mode<synchronous>, transform_indices = @transform_1, window_bounds = array<i64: 128, 128>}, {pipeline_mode = #tpu.pipeline_mode<synchronous>, transform_indices = @transform_2, window_bounds = array<i64: 1, 128>}, {pipeline_mode = #tpu.pipeline_mode<synchronous>, transform_indices = @transform_3, window_bounds = array<i64: 128, 128>}, {pipeline_mode = #tpu.pipeline_mode<synchronous>, transform_indices = @transform_4, window_bounds = array<i64: 3, 128>}, {transform_indices = @transform_5, window_bounds = array<i64: 16, 128>}]} {
    %c0 = arith.constant 0 : index
    %c0_0 = arith.constant 0 : index
    %0 = vector.load %arg1[%c0, %c0_0] : memref<16x128xf32, #tpu.memory_space<vmem>>, vector<16x128xf32>
    %1 = arith.truncf %0 : vector<16x128xf32> to vector<16x128xbf16>
    %c0_1 = arith.constant 0 : index
    %c0_2 = arith.constant 0 : index
    %2 = vector.load %arg2[%c0_1, %c0_2] : memref<128x128xbf16, #tpu.memory_space<vmem>>, vector<128x128xbf16>
    %cst = arith.constant dense<0.000000e+00> : vector<16x128xf32>
    %3 = tpu.matmul %1, %2, %cst {dimension_numbers = #tpu.dot_dimension_numbers<[1], [0], [0], [1], [0, 0, 1, 1], [], []>} : vector<16x128xbf16>, vector<128x128xbf16>, vector<16x128xf32> -> vector<16x128xf32>
    %c0_3 = arith.constant 0 : index
    %c0_4 = arith.constant 0 : index
    %4 = vector.load %arg3[%c0_3, %c0_4] : memref<1x128xf32, #tpu.memory_space<vmem>>, vector<1x128xf32>
    %5 = vector.broadcast %4 : vector<1x128xf32> to vector<16x128xf32>
    %6 = arith.addf %3, %5 : vector<16x128xf32>
    %cst_5 = arith.constant 5.000000e-01 : f32
    %7 = vector.broadcast %cst_5 : f32 to vector<16x128xf32>
    %8 = arith.mulf %7, %6 : vector<16x128xf32>
    %cst_6 = arith.constant 0.707106769 : f32
    %9 = vector.broadcast %cst_6 : f32 to vector<16x128xf32>
    %10 = arith.mulf %6, %9 : vector<16x128xf32>
    %11 = math.erf %10 : vector<16x128xf32>
    %cst_7 = arith.constant 1.000000e+00 : f32
    %12 = vector.broadcast %cst_7 : f32 to vector<16x128xf32>
    %13 = arith.addf %12, %11 : vector<16x128xf32>
    %14 = arith.mulf %8, %13 : vector<16x128xf32>
    %15 = arith.truncf %14 : vector<16x128xf32> to vector<16x128xbf16>
    %c0_8 = arith.constant 0 : index
    %c0_9 = arith.constant 0 : index
    %16 = vector.load %arg4[%c0_8, %c0_9] : memref<128x128xbf16, #tpu.memory_space<vmem>>, vector<128x128xbf16>
    %cst_10 = arith.constant dense<0.000000e+00> : vector<16x128xf32>
    %17 = tpu.matmul %15, %16, %cst_10 {dimension_numbers = #tpu.dot_dimension_numbers<[1], [0], [0], [1], [0, 0, 1, 1], [], []>} : vector<16x128xbf16>, vector<128x128xbf16>, vector<16x128xf32> -> vector<16x128xf32>
    %c0_11 = arith.constant 0 : index
    %c0_12 = arith.constant 0 : index
    %18 = vector.load %arg5[%c0_11, %c0_12] : memref<3x128xf32, #tpu.memory_space<vmem>>, vector<3x128xf32>
    %19 = vector.extract_strided_slice %18 {offsets = [0, 0], sizes = [1, 128], strides = [1, 1]} : vector<3x128xf32> to vector<1x128xf32>
    %20 = vector.extract_strided_slice %18 {offsets = [1, 0], sizes = [1, 128], strides = [1, 1]} : vector<3x128xf32> to vector<1x128xf32>
    %21 = vector.extract_strided_slice %18 {offsets = [2, 0], sizes = [1, 128], strides = [1, 1]} : vector<3x128xf32> to vector<1x128xf32>
    %22 = vector.broadcast %19 : vector<1x128xf32> to vector<16x128xf32>
    %23 = arith.addf %17, %22 : vector<16x128xf32>
    %cst_13 = arith.constant dense<0.000000e+00> : vector<16xf32>
    %24 = vector.multi_reduction <add>, %23, %cst_13 [1] : vector<16x128xf32> to vector<16xf32>
    %25 = vector.shape_cast %24 : vector<16xf32> to vector<16x1xf32>
    %cst_14 = arith.constant 3.125000e-02 : f32
    %26 = vector.broadcast %cst_14 : f32 to vector<16x1xf32>
    %27 = arith.mulf %25, %26 : vector<16x1xf32>
    %28 = vector.broadcast %27 : vector<16x1xf32> to vector<16x128xf32>
    %29 = arith.subf %23, %28 : vector<16x128xf32>
    %30 = arith.mulf %29, %29 : vector<16x128xf32>
    %cst_15 = arith.constant dense<0.000000e+00> : vector<16xf32>
    %31 = vector.multi_reduction <add>, %30, %cst_15 [1] : vector<16x128xf32> to vector<16xf32>
    %32 = vector.shape_cast %31 : vector<16xf32> to vector<16x1xf32>
    %cst_16 = arith.constant 9.600000e+01 : f32
    %33 = vector.broadcast %cst_16 : f32 to vector<16x1xf32>
    %34 = arith.mulf %33, %27 : vector<16x1xf32>
    %35 = arith.mulf %34, %27 : vector<16x1xf32>
    %36 = arith.subf %32, %35 : vector<16x1xf32>
    %cst_17 = arith.constant 3.125000e-02 : f32
    %37 = vector.broadcast %cst_17 : f32 to vector<16x1xf32>
    %38 = arith.mulf %36, %37 : vector<16x1xf32>
    %cst_18 = arith.constant 9.99999974E-6 : f32
    %39 = vector.broadcast %cst_18 : f32 to vector<16x1xf32>
    %40 = arith.addf %38, %39 : vector<16x1xf32>
    %41 = math.rsqrt %40 : vector<16x1xf32>
    %42 = vector.broadcast %41 : vector<16x1xf32> to vector<16x128xf32>
    %43 = arith.mulf %29, %42 : vector<16x128xf32>
    %44 = vector.broadcast %20 : vector<1x128xf32> to vector<16x128xf32>
    %45 = arith.mulf %43, %44 : vector<16x128xf32>
    %46 = vector.broadcast %21 : vector<1x128xf32> to vector<16x128xf32>
    %47 = arith.addf %45, %46 : vector<16x128xf32>
    %48 = arith.addf %47, %0 : vector<16x128xf32>
    %c0_19 = arith.constant 0 : index
    %c0_20 = arith.constant 0 : index
    %49 = vector.load %arg6[%c0_19, %c0_20] : memref<16x128xf32, #tpu.memory_space<vmem>>, vector<16x128xf32>
    tpu.vector_store %arg6[%c0_19, %c0_20], %48 {strides = array<i32>} : memref<16x128xf32, #tpu.memory_space<vmem>>, vector<16x128xf32>,
    return
  }
  func.func @transform_0(%arg0: i32) -> (i32, i32) {
    %c0_i32 = arith.constant 0 : i32
    %c0_i32_0 = arith.constant 0 : i32
    return %arg0, %c0_i32 : i32, i32
  }
  func.func @transform_1(%arg0: i32) -> (i32, i32) {
    %c0_i32 = arith.constant 0 : i32
    %c0_i32_0 = arith.constant 0 : i32
    %c0_i32_1 = arith.constant 0 : i32
    return %c0_i32, %c0_i32_0 : i32, i32
  }
  func.func @transform_2(%arg0: i32) -> (i32, i32) {
    %c0_i32 = arith.constant 0 : i32
    %c0_i32_0 = arith.constant 0 : i32
    %c0_i32_1 = arith.constant 0 : i32
    return %c0_i32, %c0_i32_0 : i32, i32
  }
  func.func @transform_3(%arg0: i32) -> (i32, i32) {
    %c0_i32 = arith.constant 0 : i32
    %c0_i32_0 = arith.constant 0 : i32
    %c0_i32_1 = arith.constant 0 : i32
    return %c0_i32, %c0_i32_0 : i32, i32
  }
  func.func @transform_4(%arg0: i32) -> (i32, i32) {
    %c0_i32 = arith.constant 0 : i32
    %c0_i32_0 = arith.constant 0 : i32
    %c0_i32_1 = arith.constant 0 : i32
    return %c0_i32, %c0_i32_0 : i32, i32
  }
  func.func @transform_5(%arg0: i32) -> (i32, i32) {
    %c0_i32 = arith.constant 0 : i32
    %c0_i32_0 = arith.constant 0 : i32
    return %arg0, %c0_i32 : i32, i32
  }
}

module attributes {stable_mosaic.version = 11 : i64} {
  func.func @_fe_resident_kernel(%arg0: i32, %arg1: memref<16x128xf32, #tpu.memory_space<vmem>>, %arg2: memref<128x128xbf16, #tpu.memory_space<vmem>>, %arg3: memref<1x128xf32, #tpu.memory_space<vmem>>, %arg4: memref<128x128xbf16, #tpu.memory_space<vmem>>, %arg5: memref<3x128xf32, #tpu.memory_space<vmem>>, %arg6: memref<16x128xf32, #tpu.memory_space<vmem>>) attributes {dimension_semantics = [#tpu.dimension_semantics<parallel>], iteration_bounds = array<i64: 1>, scalar_prefetch = 0 : i64, scratch_operands = 0 : i64, tpu.core_type = #tpu.core_type<tc>, window_params = [{transform_indices = @transform_0, window_bounds = array<i64: 16, 128>}, {pipeline_mode = #tpu.pipeline_mode<synchronous>, transform_indices = @transform_1, window_bounds = array<i64: 128, 128>}, {pipeline_mode = #tpu.pipeline_mode<synchronous>, transform_indices = @transform_2, window_bounds = array<i64: 1, 128>}, {pipeline_mode = #tpu.pipeline_mode<synchronous>, transform_indices = @transform_3, window_bounds = array<i64: 128, 128>}, {pipeline_mode = #tpu.pipeline_mode<synchronous>, transform_indices = @transform_4, window_bounds = array<i64: 3, 128>}, {transform_indices = @transform_5, window_bounds = array<i64: 16, 128>}]} {
    %c0 = arith.constant 0 : index
    %c0_0 = arith.constant 0 : index
    %0 = vector.load %arg1[%c0, %c0_0] : memref<16x128xf32, #tpu.memory_space<vmem>>, vector<16x128xf32>
    %1 = arith.truncf %0 : vector<16x128xf32> to vector<16x128xbf16>
    %c0_1 = arith.constant 0 : index
    %c0_2 = arith.constant 0 : index
    %2 = vector.load %arg2[%c0_1, %c0_2] : memref<128x128xbf16, #tpu.memory_space<vmem>>, vector<128x128xbf16>
    %cst = arith.constant dense<0.000000e+00> : vector<16x128xf32>
    %3 = tpu.matmul %1, %2, %cst {dimension_numbers = #tpu.dot_dimension_numbers<[1], [0], [0], [1], [0, 0, 1, 1], [], []>} : vector<16x128xbf16>, vector<128x128xbf16>, vector<16x128xf32> -> vector<16x128xf32>
    %c0_3 = arith.constant 0 : index
    %c0_4 = arith.constant 0 : index
    %4 = vector.load %arg3[%c0_3, %c0_4] : memref<1x128xf32, #tpu.memory_space<vmem>>, vector<1x128xf32>
    %5 = vector.broadcast %4 : vector<1x128xf32> to vector<16x128xf32>
    %6 = arith.addf %3, %5 : vector<16x128xf32>
    %cst_5 = arith.constant 5.000000e-01 : f32
    %7 = vector.broadcast %cst_5 : f32 to vector<16x128xf32>
    %8 = arith.mulf %7, %6 : vector<16x128xf32>
    %cst_6 = arith.constant 0.707106769 : f32
    %9 = vector.broadcast %cst_6 : f32 to vector<16x128xf32>
    %10 = arith.mulf %6, %9 : vector<16x128xf32>
    %11 = math.erf %10 : vector<16x128xf32>
    %cst_7 = arith.constant 1.000000e+00 : f32
    %12 = vector.broadcast %cst_7 : f32 to vector<16x128xf32>
    %13 = arith.addf %12, %11 : vector<16x128xf32>
    %14 = arith.mulf %8, %13 : vector<16x128xf32>
    %15 = arith.truncf %14 : vector<16x128xf32> to vector<16x128xbf16>
    %c0_8 = arith.constant 0 : index
    %c0_9 = arith.constant 0 : index
    %16 = vector.load %arg4[%c0_8, %c0_9] : memref<128x128xbf16, #tpu.memory_space<vmem>>, vector<128x128xbf16>
    %cst_10 = arith.constant dense<0.000000e+00> : vector<16x128xf32>
    %17 = tpu.matmul %15, %16, %cst_10 {dimension_numbers = #tpu.dot_dimension_numbers<[1], [0], [0], [1], [0, 0, 1, 1], [], []>} : vector<16x128xbf16>, vector<128x128xbf16>, vector<16x128xf32> -> vector<16x128xf32>
    %c0_11 = arith.constant 0 : index
    %c0_12 = arith.constant 0 : index
    %18 = vector.load %arg5[%c0_11, %c0_12] : memref<3x128xf32, #tpu.memory_space<vmem>>, vector<3x128xf32>
    %19 = vector.extract_strided_slice %18 {offsets = [0, 0], sizes = [1, 128], strides = [1, 1]} : vector<3x128xf32> to vector<1x128xf32>
    %20 = vector.extract_strided_slice %18 {offsets = [1, 0], sizes = [1, 128], strides = [1, 1]} : vector<3x128xf32> to vector<1x128xf32>
    %21 = vector.extract_strided_slice %18 {offsets = [2, 0], sizes = [1, 128], strides = [1, 1]} : vector<3x128xf32> to vector<1x128xf32>
    %22 = vector.broadcast %19 : vector<1x128xf32> to vector<16x128xf32>
    %23 = arith.addf %17, %22 : vector<16x128xf32>
    %cst_13 = arith.constant dense<0.000000e+00> : vector<16xf32>
    %24 = vector.multi_reduction <add>, %23, %cst_13 [1] : vector<16x128xf32> to vector<16xf32>
    %25 = vector.shape_cast %24 : vector<16xf32> to vector<16x1xf32>
    %cst_14 = arith.constant 3.125000e-02 : f32
    %26 = vector.broadcast %cst_14 : f32 to vector<16x1xf32>
    %27 = arith.mulf %25, %26 : vector<16x1xf32>
    %28 = vector.broadcast %27 : vector<16x1xf32> to vector<16x128xf32>
    %29 = arith.subf %23, %28 : vector<16x128xf32>
    %30 = arith.mulf %29, %29 : vector<16x128xf32>
    %cst_15 = arith.constant dense<0.000000e+00> : vector<16xf32>
    %31 = vector.multi_reduction <add>, %30, %cst_15 [1] : vector<16x128xf32> to vector<16xf32>
    %32 = vector.shape_cast %31 : vector<16xf32> to vector<16x1xf32>
    %cst_16 = arith.constant 9.600000e+01 : f32
    %33 = vector.broadcast %cst_16 : f32 to vector<16x1xf32>
    %34 = arith.mulf %33, %27 : vector<16x1xf32>
    %35 = arith.mulf %34, %27 : vector<16x1xf32>
    %36 = arith.subf %32, %35 : vector<16x1xf32>
    %cst_17 = arith.constant 3.125000e-02 : f32
    %37 = vector.broadcast %cst_17 : f32 to vector<16x1xf32>
    %38 = arith.mulf %36, %37 : vector<16x1xf32>
    %cst_18 = arith.constant 9.99999974E-6 : f32
    %39 = vector.broadcast %cst_18 : f32 to vector<16x1xf32>
    %40 = arith.addf %38, %39 : vector<16x1xf32>
    %41 = math.rsqrt %40 : vector<16x1xf32>
    %42 = vector.broadcast %41 : vector<16x1xf32> to vector<16x128xf32>
    %43 = arith.mulf %29, %42 : vector<16x128xf32>
    %44 = vector.broadcast %20 : vector<1x128xf32> to vector<16x128xf32>
    %45 = arith.mulf %43, %44 : vector<16x128xf32>
    %46 = vector.broadcast %21 : vector<1x128xf32> to vector<16x128xf32>
    %47 = arith.addf %45, %46 : vector<16x128xf32>
    %48 = arith.addf %47, %0 : vector<16x128xf32>
    %c0_19 = arith.constant 0 : index
    %c0_20 = arith.constant 0 : index
    %49 = vector.load %arg6[%c0_19, %c0_20] : memref<16x128xf32, #tpu.memory_space<vmem>>, vector<16x128xf32>
    tpu.vector_store %arg6[%c0_19, %c0_20], %48 {strides = array<i32>} : memref<16x128xf32, #tpu.memory_space<vmem>>, vector<16x128xf32>,
    return
  }
  func.func @transform_0(%arg0: i32) -> (i32, i32) {
    %c0_i32 = arith.constant 0 : i32
    %c0_i32_0 = arith.constant 0 : i32
    return %arg0, %c0_i32 : i32, i32
  }
  func.func @transform_1(%arg0: i32) -> (i32, i32) {
    %c0_i32 = arith.constant 0 : i32
    %c0_i32_0 = arith.constant 0 : i32
    %c0_i32_1 = arith.constant 0 : i32
    return %c0_i32, %c0_i32_0 : i32, i32
  }
  func.func @transform_2(%arg0: i32) -> (i32, i32) {
    %c0_i32 = arith.constant 0 : i32
    %c0_i32_0 = arith.constant 0 : i32
    %c0_i32_1 = arith.constant 0 : i32
    return %c0_i32, %c0_i32_0 : i32, i32
  }
  func.func @transform_3(%arg0: i32) -> (i32, i32) {
    %c0_i32 = arith.constant 0 : i32
    %c0_i32_0 = arith.constant 0 : i32
    %c0_i32_1 = arith.constant 0 : i32
    return %c0_i32, %c0_i32_0 : i32, i32
  }
  func.func @transform_4(%arg0: i32) -> (i32, i32) {
    %c0_i32 = arith.constant 0 : i32
    %c0_i32_0 = arith.constant 0 : i32
    %c0_i32_1 = arith.constant 0 : i32
    return %c0_i32, %c0_i32_0 : i32, i32
  }
  func.func @transform_5(%arg0: i32) -> (i32, i32) {
    %c0_i32 = arith.constant 0 : i32
    %c0_i32_0 = arith.constant 0 : i32
    return %arg0, %c0_i32 : i32, i32
  }
}

</mosaic_0001>

<bundles_post_ra>
// kernel: tpu_custom_call.1
= control target key start
LH: loop header
LB: loop body
LE: loop exit
PB: predicated region body
PF: predicated region fallthrough
CT: control target
= control target key end

     0   :  { %10 = vsyncpa [#allocation3], 0  ;;  %s678_s0 = inlined_call_operand.hbm [shape: f32[16,128], index: 0, kind: input, shape index: {}]   ;;  %s679_s1 = inlined_call_operand.hbm [shape: bf16[128,128], index: 1, kind: input, shape index: {}]   ;;  %s680_s2 = inlined_call_operand.vmem [shape: f32[1,128], index: 2, kind: input, shape index: {}]   ;;  %s681_s3 = inlined_call_operand.hbm [shape: bf16[128,128], index: 3, kind: input, shape index: {}]   ;;  %s682_s4 = inlined_call_operand.vmem [shape: f32[3,128], index: 4, kind: input, shape index: {}]   ;;  %s683_s5 = inlined_call_operand.hbm [shape: f32[16,128], index: 5, kind: output, shape index: {}]  }
   0x1   :  { %11 = vsyncpa [#allocation6], 0 }
   0x2   :  { %12 = vsyncpa [#allocation4], 0  ;;  %s564_s18 = smov [#allocation5]   ;;  %s470_s22 = scalar_lea.hbm %s679_s1, 1024 }
   0x3   :  { %s30_s19 = sshll.u32 %s564_s18, 4  ;;  %p471_p0 = scmp.ne.s32.totalorder %s679_s1, %s470_s22  ;;  %s31_s19 = int_to_ptr.vmem [resolvable:$true] %s30_s19 }
   0x4   :  { %p474_p1 = scmp.lt.u32.totalorder %s470_s22, %s679_s1 }
   0x6   :  { %p476_p2 = pnand %p474_p1, %p471_p0 }
   0x8   :  { %479 = shalt.err (!%p476_p2)
}
   0x9   :  { %s480_s27 = scalar_lea.vmem %s31_s19, 1024  ;;  %p485_p4 = scmp.lt.s32.totalorder %s31_s19, %s31_s19 }
   0xa   :  { %p481_p3 = scmp.ne.s32.totalorder %s31_s19, %s480_s27  ;;  %p486_p5 = scmp.lt.s32.totalorder %s480_s27, %s480_s27 }
   0xc   :  { %p487_p6 = por %p486_p5, %p485_p4 }
   0xe   :  { %p488_p7 = pnand %p487_p6, %p481_p3 }
  0x10   :  { %491 = shalt.err (!%p488_p7)
}
  0x11   :  { %s565_s28 = smov 64   ;;  %s566_s29 = smov 4  }
  0x12   :  { %36 = dma.hbm_to_vmem [thread:$0]  %s679_s1, 1024, %s31_s19, [#allocation6], %s565_s28, %s565_s28, %s566_s29  }
  0x13   :  { %s567_s7 = smov [#allocation2]   ;;  %s492_s11 = scalar_lea.hbm %s678_s0, 256 }
  0x14   :  { %s18_s8 = sshll.u32 %s567_s7, 4  ;;  %p493_p8 = scmp.ne.s32.totalorder %s678_s0, %s492_s11  ;;  %s19_s8 = int_to_ptr.vmem [resolvable:$true] %s18_s8 }
  0x15   :  { %p496_p9 = scmp.lt.u32.totalorder %s492_s11, %s678_s0 }
  0x17   :  { %p498_p10 = pnand %p496_p9, %p493_p8 }
  0x19   :  { %501 = shalt.err (!%p498_p10)
}
  0x1a   :  { %s502_s16 = scalar_lea.vmem %s19_s8, 256  ;;  %p507_p12 = scmp.lt.s32.totalorder %s19_s8, %s19_s8 }
  0x1b   :  { %p503_p11 = scmp.ne.s32.totalorder %s19_s8, %s502_s16  ;;  %p508_p13 = scmp.lt.s32.totalorder %s502_s16, %s502_s16 }
  0x1d   :  { %p509_p0 = por %p508_p13, %p507_p12 }
  0x1f   :  { %p510_p1 = pnand %p509_p0, %p503_p11 }
  0x21   :  { %513 = shalt.err (!%p510_p1)
}
  0x22   :  { %s568_s1 = smov 128   ;;  %s569_s17 = smov 8  }
  0x23   :  { %24 = dma.hbm_to_vmem [thread:$0]  %s678_s0, 256, %s19_s8, [#allocation3], %s568_s1, %s568_s1, %s569_s17  }
  0x24   :  { %s570_s20 = smov [#allocation7]   ;;  %s514_s24 = scalar_lea.hbm %s681_s3, 1024 }
  0x25   :  { %s44_s21 = sshll.u32 %s570_s20, 4  ;;  %p515_p2 = scmp.ne.s32.totalorder %s681_s3, %s514_s24  ;;  %s45_s21 = int_to_ptr.vmem [resolvable:$true] %s44_s21 }
  0x26   :  { %p518_p3 = scmp.lt.u32.totalorder %s514_s24, %s681_s3 }
  0x28   :  { %p520_p4 = pnand %p518_p3, %p515_p2 }
  0x2a   :  { %523 = shalt.err (!%p520_p4)
}
  0x2b   :  { %s524_s6 = scalar_lea.vmem %s45_s21, 1024  ;;  %p529_p6 = scmp.lt.s32.totalorder %s45_s21, %s45_s21 }
  0x2c   :  { %p525_p5 = scmp.ne.s32.totalorder %s45_s21, %s524_s6  ;;  %p530_p7 = scmp.lt.s32.totalorder %s524_s6, %s524_s6 }
  0x2e   :  { %p531_p8 = por %p530_p7, %p529_p6 }
  0x30   :  { %p532_p9 = pnand %p531_p8, %p525_p5 }
  0x32   :  { %535 = shalt.err (!%p532_p9)
}
  0x33   :  { %50 = dma.hbm_to_vmem [thread:$0]  %s681_s3, 1024, %s45_s21, [#allocation6], %s565_s28, %s565_s28, %s566_s29  }
  0x34   :  { %558 = dma.done.wait [#allocation3], 256  }
  0x35   :  { %559 = vsyncadd [#allocation3], 4294967040 }
  0x36   :  { %560 = dma.done.wait [#allocation6], 2048  }
  0x37   :  { %561 = vsyncadd [#allocation6], 4294965248  ;;  %v571_v0 = vmov 0.0   ;;  %vm572_vm0 = vmmov 0   ;;  %v446_v1 = vld [vmem:[#allocation5] sm:$0xff]   ;;  %v447_v2 = vld [vmem:[#allocation5 + $0x8] sm:$0xff]   ;;  %v206_v38 = vlaneseq }
  0x38   :  { %396 = vmatprep.subr.bf16.mxu0 %v571_v0  ;;  %412 = vmatprep.mubr.msk.bf16.mxu0 %vm572_vm0, %v571_v0  ;;  %v448_v3 = vld [vmem:[#allocation5 + $0x10] sm:$0xff]   ;;  %v454_v4 = vld [vmem:[#allocation7] sm:$0xff]   ;;  %v449_v5 = vld [vmem:[#allocation5 + $0x18] sm:$0xff]  }
  0x39   :  { %416 = vmatprep.subr.bf16.mxu1 %v571_v0  ;;  %432 = vmatprep.mubr.msk.bf16.mxu1 %vm572_vm0, %v571_v0  ;;  %v455_v6 = vld [vmem:[#allocation7 + $0x8] sm:$0xff]   ;;  %v450_v7 = vld [vmem:[#allocation5 + $0x20] sm:$0xff]   ;;  %v452_v9 = vld [vmem:[#allocation5 + $0x30] sm:$0xff]   ;;  %v207_v39 = vshrl.u32 %v206_v38, 7 }
  0x3a   :  { %397 = vmatpush3.bf16.msra.mxu0 %v446_v1  ;;  %417 = vmatpush3.bf16.msra.mxu1 %v454_v4  ;;  %v451_v8 = vld [vmem:[#allocation5 + $0x28] sm:$0xff]   ;;  %v453_v10 = vld [vmem:[#allocation5 + $0x38] sm:$0xff]   ;;  %v649_v11 = vld [vmem:[#allocation2] sm:$0xff] }
  0x3b   :  { %398 = vmatprep.subr.bf16.mxu0 %v571_v0  ;;  %418 = vmatprep.subr.bf16.mxu1 %v571_v0  ;;  %v651_v12 = vld [vmem:[#allocation2 + $0x8] sm:$0xff]  ;;  %v456_v14 = vld [vmem:[#allocation7 + $0x10] sm:$0xff]   ;;  %v458_v16 = vld [vmem:[#allocation7 + $0x20] sm:$0xff]   ;;  %v208_v40 = vsub.s32 0, %v207_v39 }
  0x3c   :  { %v65_v13 = vpack.c.bf16 %v651_v12, %v649_v11  ;;  %v457_v15 = vld [vmem:[#allocation7 + $0x18] sm:$0xff]   ;;  %v459_v17 = vld [vmem:[#allocation7 + $0x28] sm:$0xff]   ;;  %v460_v18 = vld [vmem:[#allocation7 + $0x30] sm:$0xff]  }
  0x3d   :  { %v461_v19 = vld [vmem:[#allocation7 + $0x38] sm:$0xff]   ;;  %v361_v20 = vld [vmem:[%s680_s2] ss:$0 sm:$0xff] }
  0x3e   :  { %399 = vmatpush3.bf16.msra.mxu0 %v447_v2  ;;  %419 = vmatpush3.bf16.msra.mxu1 %v455_v6  ;;  %v205_v41 = vld [vmem:[%s682_s4] sm:$0x7]  ;;  %v335_v6 = vsub.s32 2, %v207_v39  ;;  %s573_s4 = smov [#allocation8]  }
  0x3f   :  { %400 = vmatprep.subr.bf16.mxu0 %v571_v0  ;;  %420 = vmatprep.subr.bf16.mxu1 %v571_v0  ;;  %v209_v42 = vrot.slane %v205_v41, %v208_v40  ;;  %s348_s8 = sshll.u32 %s573_s4, 4  ;;  %s349_s8 = int_to_ptr.vmem [resolvable:$true] %s348_s8 }
  0x40   :  { %s536_s9 = scalar_lea.vmem %s349_s8, 256  ;;  %p541_p11 = scmp.lt.s32.totalorder %s349_s8, %s349_s8 }
  0x41   :  { %p537_p10 = scmp.ne.s32.totalorder %s349_s8, %s536_s9  ;;  %p542_p12 = scmp.lt.s32.totalorder %s536_s9, %s536_s9 }
  0x42   :  { %401 = vmatpush3.bf16.msra.mxu0 %v448_v3  ;;  %421 = vmatpush3.bf16.msra.mxu1 %v456_v14 }
  0x43   :  { %402 = vmatprep.subr.bf16.mxu0 %v571_v0  ;;  %422 = vmatprep.subr.bf16.mxu1 %v571_v0  ;;  %p543_p13 = por %p542_p12, %p541_p11 }
  0x45   :  { %p544_p0 = pnand %p543_p13, %p537_p10 }
  0x46   :  { %403 = vmatpush3.bf16.msra.mxu0 %v449_v5  ;;  %423 = vmatpush3.bf16.msra.mxu1 %v457_v15  ;;  %v329_v5 = vsub.s32 1, %v207_v39 }
  0x47   :  { %404 = vmatprep.subr.bf16.mxu0 %v571_v0  ;;  %424 = vmatprep.subr.bf16.mxu1 %v571_v0 }
  0x4a   :  { %405 = vmatpush3.bf16.msra.mxu0 %v450_v7  ;;  %425 = vmatpush3.bf16.msra.mxu1 %v458_v16  ;;  %v330_v7 = vrot.slane %v205_v41, %v329_v5 }
  0x4b   :  { %406 = vmatprep.subr.bf16.mxu0 %v571_v0  ;;  %426 = vmatprep.subr.bf16.mxu1 %v571_v0 }
  0x4e   :  { %407 = vmatpush3.bf16.msra.mxu0 %v451_v8  ;;  %427 = vmatpush3.bf16.msra.mxu1 %v459_v17 }
  0x4f   :  { %408 = vmatprep.subr.bf16.mxu0 %v571_v0  ;;  %428 = vmatprep.subr.bf16.mxu1 %v571_v0 }
  0x52   :  { %409 = vmatpush3.bf16.msra.mxu0 %v452_v9  ;;  %429 = vmatpush3.bf16.msra.mxu1 %v460_v18  ;;  %v336_v9 = vrot.slane %v205_v41, %v335_v6 }
  0x53   :  { %410 = vmatprep.subr.bf16.mxu0 %v571_v0  ;;  %430 = vmatprep.subr.bf16.mxu1 %v571_v0 }
  0x56   :  { %411 = vmatpush3.bf16.msra.mxu0 %v453_v10  ;;  %431 = vmatpush3.bf16.msra.mxu1 %v461_v19 }
  0x59   :  { %413 = vmatmul.mubr.bf16.vlgmr.msra.gmra.mrb[0].mxu0 %v65_v13 }
 0x12c   :  { %v171_v21 = vpop.f32.mrb[0].mxu0 }
 0x12d   :  { %v172_v22 = vadd.f32 %v361_v20, %v171_v21  ;;  %v414_v23 = vpop.f32.mrb[1].mxu0 }
 0x12e   :  { %v174_v24 = vpop.f32.mrb[2].mxu0 }
 0x12f   :  { %v180_v25 = vmul.f32 0.70710677, %v172_v22  ;;  %v175_v26 = vadd.f32 %v361_v20, %v174_v24  ;;  %v415_v27 = vpop.f32.mrb[3].mxu0  ;;  %v178_v32 = vmul.f32 0.5, %v172_v22 }
 0x131   :  { %462 = verf.f32 %v180_v25  ;;  %v181_v28 = vmul.f32 0.70710677, %v175_v26  ;;  %v179_v33 = vmul.f32 0.5, %v175_v26 }
 0x133   :  { %464 = verf.f32 %v181_v28 }
 0x13b   :  { %v463_v29 = vpop.eup %462 }
 0x13c   :  { %v184_v30 = vadd.f32 1.0, %v463_v29 }
 0x13d   :  { %v465_v31 = vpop.eup %464 }
 0x13e   :  { %v185_v34 = vadd.f32 1.0, %v465_v31  ;;  %v186_v35 = vmul.f32 %v184_v30, %v178_v32 }
 0x140   :  { %v187_v36 = vmul.f32 %v185_v34, %v179_v33 }
 0x142   :  { %v188_v37 = vpack.c.bf16 %v187_v36, %v186_v35 }
 0x144   :  { %433 = vmatmul.mubr.bf16.vlgmr.msra.gmra.mrb[0].mxu1 %v188_v37 }
 0x217   :  { %v292_v43 = vpop.f32.mrb[0].mxu1 }
 0x218   :  { %v293_v44 = vadd.f32 %v292_v43, %v209_v42  ;;  %v434_v45 = vpop.f32.mrb[1].mxu1 }
 0x219   :  { %v295_v46 = vpop.f32.mrb[2].mxu1 }
 0x21a   :  { %299 = vadd.xlane.f32.xlu0 %v293_v44  ;;  %v435_v47 = vpop.f32.mrb[3].mxu1  ;;  %v296_v48 = vadd.f32 %v295_v46, %v209_v42 }
 0x21e   :  { %301 = vadd.xlane.f32.xlu0 %v296_v48 }
 0x2a7   :  { %v300_v49 = vpop.xlane.xlu0 %299 }
 0x2a8   :  { %v303_v50 = vmul.f32 0.03125, %v300_v49 }
 0x2aa   :  { %v305_v51 = vsub.f32 %v293_v44, %v303_v50  ;;  %v313_v57 = vmul.f32 96.0, %v303_v50 }
 0x2ab   :  { %v302_v52 = vpop.xlane.xlu0 %301 }
 0x2ac   :  { %v304_v53 = vmul.f32 0.03125, %v302_v52  ;;  %v307_v54 = vmul.f32 %v305_v51, %v305_v51  ;;  %v315_v59 = vmul.f32 %v313_v57, %v303_v50 }
 0x2ae   :  { %309 = vadd.xlane.f32.xlu1 %v307_v54  ;;  %v306_v55 = vsub.f32 %v296_v48, %v304_v53  ;;  %v314_v58 = vmul.f32 96.0, %v304_v53 }
 0x2b0   :  { %v308_v56 = vmul.f32 %v306_v55, %v306_v55  ;;  %v316_v63 = vmul.f32 %v314_v58, %v304_v53 }
 0x2b2   :  { %311 = vadd.xlane.f32.xlu1 %v308_v56 }
 0x33b   :  { %v310_v60 = vpop.xlane.xlu1 %309 }
 0x33c   :  { %v317_v61 = vsub.f32 %v310_v60, %v315_v59 }
 0x33e   :  { %v319_v62 = vmul.f32 0.03125, %v317_v61 }
 0x33f   :  { %v312_v0 = vpop.xlane.xlu1 %311 }
 0x340   :  { %v321_v1 = vadd.f32 1e-05, %v319_v62  ;;  %v318_v2 = vsub.f32 %v312_v0, %v316_v63 }
 0x342   :  { %466 = vrsqrt.f32 %v321_v1  ;;  %v320_v3 = vmul.f32 0.03125, %v318_v2 }
 0x344   :  { %v322_v4 = vadd.f32 1e-05, %v320_v3 }
 0x346   :  { %468 = vrsqrt.f32 %v322_v4 }
 0x34c   :  { %v467_v8 = vpop.eup %466 }
 0x34d   :  { %v325_v10 = vmul.f32 %v467_v8, %v305_v51 }
 0x34f   :  { %v331_v13 = vmul.f32 %v330_v7, %v325_v10 }
 0x350   :  { %v469_v14 = vpop.eup %468 }
 0x351   :  { %v326_v15 = vmul.f32 %v469_v14, %v306_v55  ;;  %v337_v16 = vadd.f32 %v336_v9, %v331_v13 }
 0x353   :  { %v332_v17 = vmul.f32 %v330_v7, %v326_v15  ;;  %v339_v18 = vadd.f32 %v337_v16, %v649_v11 }
 0x355   :  { %v338_v19 = vadd.f32 %v336_v9, %v332_v17  ;;  %341 = vst [vmem:[#allocation8] sm:$0xff] %v339_v18 }
 0x357   :  { %v340_v20 = vadd.f32 %v338_v19, %v651_v12 }
 0x359   :  { %342 = vst [vmem:[#allocation8 + $0x8] sm:$0xff] %v340_v20 }
 0x35a   :  { %547 = shalt.err (!%p544_p0)
}
 0x35b   :  { %s548_s12 = scalar_lea.hbm %s683_s5, 256 }
 0x35c   :  { %p549_p1 = scmp.ne.s32.totalorder %s683_s5, %s548_s12  ;;  %p552_p2 = scmp.lt.u32.totalorder %s548_s12, %s683_s5 }
 0x35e   :  { %p554_p3 = pnand %p552_p2, %p549_p1 }
 0x360   :  { %557 = shalt.err (!%p554_p3)
}
 0x361   :  { %354 = dma.vmem_to_hbm [thread:$0]  %s349_s8, 256, %s683_s5, [#allocation4], %s568_s1, %s568_s1, %s569_s17  }
 0x362   :  { %562 = dma.done.wait [#allocation4], 256  }
 0x363   :  { %563 = vsyncadd [#allocation4], 4294967040 }
 0x364   :  { %358 = vsyncpa [#allocation3], 1 }
 0x365   :  { %359 = vsyncpa [#allocation6], 1 }
 0x366   :  { %360 = vsyncpa [#allocation4], 1 }

// kernel: tpu_custom_call.1
= control target key start
LH: loop header
LB: loop body
LE: loop exit
PB: predicated region body
PF: predicated region fallthrough
CT: control target
= control target key end

     0   :  { %10 = vsyncpa [#allocation3], 0  ;;  %s678_s0 = inlined_call_operand.hbm [shape: f32[16,128], index: 0, kind: input, shape index: {}]   ;;  %s679_s1 = inlined_call_operand.hbm [shape: bf16[128,128], index: 1, kind: input, shape index: {}]   ;;  %s680_s2 = inlined_call_operand.vmem [shape: f32[1,128], index: 2, kind: input, shape index: {}]   ;;  %s681_s3 = inlined_call_operand.hbm [shape: bf16[128,128], index: 3, kind: input, shape index: {}]   ;;  %s682_s4 = inlined_call_operand.vmem [shape: f32[3,128], index: 4, kind: input, shape index: {}]   ;;  %s683_s5 = inlined_call_operand.hbm [shape: f32[16,128], index: 5, kind: output, shape index: {}]  }
   0x1   :  { %11 = vsyncpa [#allocation6], 0 }
   0x2   :  { %12 = vsyncpa [#allocation4], 0  ;;  %s564_s18 = smov [#allocation5]   ;;  %s470_s22 = scalar_lea.hbm %s679_s1, 1024 }
   0x3   :  { %s30_s19 = sshll.u32 %s564_s18, 4  ;;  %p471_p0 = scmp.ne.s32.totalorder %s679_s1, %s470_s22  ;;  %s31_s19 = int_to_ptr.vmem [resolvable:$true] %s30_s19 }
   0x4   :  { %p474_p1 = scmp.lt.u32.totalorder %s470_s22, %s679_s1 }
   0x6   :  { %p476_p2 = pnand %p474_p1, %p471_p0 }
   0x8   :  { %479 = shalt.err (!%p476_p2)
}
   0x9   :  { %s480_s27 = scalar_lea.vmem %s31_s19, 1024  ;;  %p485_p4 = scmp.lt.s32.totalorder %s31_s19, %s31_s19 }
   0xa   :  { %p481_p3 = scmp.ne.s32.totalorder %s31_s19, %s480_s27  ;;  %p486_p5 = scmp.lt.s32.totalorder %s480_s27, %s480_s27 }
   0xc   :  { %p487_p6 = por %p486_p5, %p485_p4 }
   0xe   :  { %p488_p7 = pnand %p487_p6, %p481_p3 }
  0x10   :  { %491 = shalt.err (!%p488_p7)
}
  0x11   :  { %s565_s28 = smov 64   ;;  %s566_s29 = smov 4  }
  0x12   :  { %36 = dma.hbm_to_vmem [thread:$0]  %s679_s1, 1024, %s31_s19, [#allocation6], %s565_s28, %s565_s28, %s566_s29  }
  0x13   :  { %s567_s7 = smov [#allocation2]   ;;  %s492_s11 = scalar_lea.hbm %s678_s0, 256 }
  0x14   :  { %s18_s8 = sshll.u32 %s567_s7, 4  ;;  %p493_p8 = scmp.ne.s32.totalorder %s678_s0, %s492_s11  ;;  %s19_s8 = int_to_ptr.vmem [resolvable:$true] %s18_s8 }
  0x15   :  { %p496_p9 = scmp.lt.u32.totalorder %s492_s11, %s678_s0 }
  0x17   :  { %p498_p10 = pnand %p496_p9, %p493_p8 }
  0x19   :  { %501 = shalt.err (!%p498_p10)
}
  0x1a   :  { %s502_s16 = scalar_lea.vmem %s19_s8, 256  ;;  %p507_p12 = scmp.lt.s32.totalorder %s19_s8, %s19_s8 }
  0x1b   :  { %p503_p11 = scmp.ne.s32.totalorder %s19_s8, %s502_s16  ;;  %p508_p13 = scmp.lt.s32.totalorder %s502_s16, %s502_s16 }
  0x1d   :  { %p509_p0 = por %p508_p13, %p507_p12 }
  0x1f   :  { %p510_p1 = pnand %p509_p0, %p503_p11 }
  0x21   :  { %513 = shalt.err (!%p510_p1)
}
  0x22   :  { %s568_s1 = smov 128   ;;  %s569_s17 = smov 8  }
  0x23   :  { %24 = dma.hbm_to_vmem [thread:$0]  %s678_s0, 256, %s19_s8, [#allocation3], %s568_s1, %s568_s1, %s569_s17  }
  0x24   :  { %s570_s20 = smov [#allocation7]   ;;  %s514_s24 = scalar_lea.hbm %s681_s3, 1024 }
  0x25   :  { %s44_s21 = sshll.u32 %s570_s20, 4  ;;  %p515_p2 = scmp.ne.s32.totalorder %s681_s3, %s514_s24  ;;  %s45_s21 = int_to_ptr.vmem [resolvable:$true] %s44_s21 }
  0x26   :  { %p518_p3 = scmp.lt.u32.totalorder %s514_s24, %s681_s3 }
  0x28   :  { %p520_p4 = pnand %p518_p3, %p515_p2 }
  0x2a   :  { %523 = shalt.err (!%p520_p4)
}
  0x2b   :  { %s524_s6 = scalar_lea.vmem %s45_s21, 1024  ;;  %p529_p6 = scmp.lt.s32.totalorder %s45_s21, %s45_s21 }
  0x2c   :  { %p525_p5 = scmp.ne.s32.totalorder %s45_s21, %s524_s6  ;;  %p530_p7 = scmp.lt.s32.totalorder %s524_s6, %s524_s6 }
  0x2e   :  { %p531_p8 = por %p530_p7, %p529_p6 }
  0x30   :  { %p532_p9 = pnand %p531_p8, %p525_p5 }
  0x32   :  { %535 = shalt.err (!%p532_p9)
}
  0x33   :  { %50 = dma.hbm_to_vmem [thread:$0]  %s681_s3, 1024, %s45_s21, [#allocation6], %s565_s28, %s565_s28, %s566_s29  }
  0x34   :  { %558 = dma.done.wait [#allocation3], 256  }
  0x35   :  { %559 = vsyncadd [#allocation3], 4294967040 }
  0x36   :  { %560 = dma.done.wait [#allocation6], 2048  }
  0x37   :  { %561 = vsyncadd [#allocation6], 4294965248  ;;  %v571_v0 = vmov 0.0   ;;  %vm572_vm0 = vmmov 0   ;;  %v446_v1 = vld [vmem:[#allocation5] sm:$0xff]   ;;  %v447_v2 = vld [vmem:[#allocation5 + $0x8] sm:$0xff]   ;;  %v206_v38 = vlaneseq }
  0x38   :  { %396 = vmatprep.subr.bf16.mxu0 %v571_v0  ;;  %412 = vmatprep.mubr.msk.bf16.mxu0 %vm572_vm0, %v571_v0  ;;  %v448_v3 = vld [vmem:[#allocation5 + $0x10] sm:$0xff]   ;;  %v454_v4 = vld [vmem:[#allocation7] sm:$0xff]   ;;  %v449_v5 = vld [vmem:[#allocation5 + $0x18] sm:$0xff]  }
  0x39   :  { %416 = vmatprep.subr.bf16.mxu1 %v571_v0  ;;  %432 = vmatprep.mubr.msk.bf16.mxu1 %vm572_vm0, %v571_v0  ;;  %v455_v6 = vld [vmem:[#allocation7 + $0x8] sm:$0xff]   ;;  %v450_v7 = vld [vmem:[#allocation5 + $0x20] sm:$0xff]   ;;  %v452_v9 = vld [vmem:[#allocation5 + $0x30] sm:$0xff]   ;;  %v207_v39 = vshrl.u32 %v206_v38, 7 }
  0x3a   :  { %397 = vmatpush3.bf16.msra.mxu0 %v446_v1  ;;  %417 = vmatpush3.bf16.msra.mxu1 %v454_v4  ;;  %v451_v8 = vld [vmem:[#allocation5 + $0x28] sm:$0xff]   ;;  %v453_v10 = vld [vmem:[#allocation5 + $0x38] sm:$0xff]   ;;  %v649_v11 = vld [vmem:[#allocation2] sm:$0xff] }
  0x3b   :  { %398 = vmatprep.subr.bf16.mxu0 %v571_v0  ;;  %418 = vmatprep.subr.bf16.mxu1 %v571_v0  ;;  %v651_v12 = vld [vmem:[#allocation2 + $0x8] sm:$0xff]  ;;  %v456_v14 = vld [vmem:[#allocation7 + $0x10] sm:$0xff]   ;;  %v458_v16 = vld [vmem:[#allocation7 + $0x20] sm:$0xff]   ;;  %v208_v40 = vsub.s32 0, %v207_v39 }
  0x3c   :  { %v65_v13 = vpack.c.bf16 %v651_v12, %v649_v11  ;;  %v457_v15 = vld [vmem:[#allocation7 + $0x18] sm:$0xff]   ;;  %v459_v17 = vld [vmem:[#allocation7 + $0x28] sm:$0xff]   ;;  %v460_v18 = vld [vmem:[#allocation7 + $0x30] sm:$0xff]  }
  0x3d   :  { %v461_v19 = vld [vmem:[#allocation7 + $0x38] sm:$0xff]   ;;  %v361_v20 = vld [vmem:[%s680_s2] ss:$0 sm:$0xff] }
  0x3e   :  { %399 = vmatpush3.bf16.msra.mxu0 %v447_v2  ;;  %419 = vmatpush3.bf16.msra.mxu1 %v455_v6  ;;  %v205_v41 = vld [vmem:[%s682_s4] sm:$0x7]  ;;  %v335_v6 = vsub.s32 2, %v207_v39  ;;  %s573_s4 = smov [#allocation8]  }
  0x3f   :  { %400 = vmatprep.subr.bf16.mxu0 %v571_v0  ;;  %420 = vmatprep.subr.bf16.mxu1 %v571_v0  ;;  %v209_v42 = vrot.slane %v205_v41, %v208_v40  ;;  %s348_s8 = sshll.u32 %s573_s4, 4  ;;  %s349_s8 = int_to_ptr.vmem [resolvable:$true] %s348_s8 }
  0x40   :  { %s536_s9 = scalar_lea.vmem %s349_s8, 256  ;;  %p541_p11 = scmp.lt.s32.totalorder %s349_s8, %s349_s8 }
  0x41   :  { %p537_p10 = scmp.ne.s32.totalorder %s349_s8, %s536_s9  ;;  %p542_p12 = scmp.lt.s32.totalorder %s536_s9, %s536_s9 }
  0x42   :  { %401 = vmatpush3.bf16.msra.mxu0 %v448_v3  ;;  %421 = vmatpush3.bf16.msra.mxu1 %v456_v14 }
  0x43   :  { %402 = vmatprep.subr.bf16.mxu0 %v571_v0  ;;  %422 = vmatprep.subr.bf16.mxu1 %v571_v0  ;;  %p543_p13 = por %p542_p12, %p541_p11 }
  0x45   :  { %p544_p0 = pnand %p543_p13, %p537_p10 }
  0x46   :  { %403 = vmatpush3.bf16.msra.mxu0 %v449_v5  ;;  %423 = vmatpush3.bf16.msra.mxu1 %v457_v15  ;;  %v329_v5 = vsub.s32 1, %v207_v39 }
  0x47   :  { %404 = vmatprep.subr.bf16.mxu0 %v571_v0  ;;  %424 = vmatprep.subr.bf16.mxu1 %v571_v0 }
  0x4a   :  { %405 = vmatpush3.bf16.msra.mxu0 %v450_v7  ;;  %425 = vmatpush3.bf16.msra.mxu1 %v458_v16  ;;  %v330_v7 = vrot.slane %v205_v41, %v329_v5 }
  0x4b   :  { %406 = vmatprep.subr.bf16.mxu0 %v571_v0  ;;  %426 = vmatprep.subr.bf16.mxu1 %v571_v0 }
  0x4e   :  { %407 = vmatpush3.bf16.msra.mxu0 %v451_v8  ;;  %427 = vmatpush3.bf16.msra.mxu1 %v459_v17 }
  0x4f   :  { %408 = vmatprep.subr.bf16.mxu0 %v571_v0  ;;  %428 = vmatprep.subr.bf16.mxu1 %v571_v0 }
  0x52   :  { %409 = vmatpush3.bf16.msra.mxu0 %v452_v9  ;;  %429 = vmatpush3.bf16.msra.mxu1 %v460_v18  ;;  %v336_v9 = vrot.slane %v205_v41, %v335_v6 }
  0x53   :  { %410 = vmatprep.subr.bf16.mxu0 %v571_v0  ;;  %430 = vmatprep.subr.bf16.mxu1 %v571_v0 }
  0x56   :  { %411 = vmatpush3.bf16.msra.mxu0 %v453_v10  ;;  %431 = vmatpush3.bf16.msra.mxu1 %v461_v19 }
  0x59   :  { %413 = vmatmul.mubr.bf16.vlgmr.msra.gmra.mrb[0].mxu0 %v65_v13 }
 0x12c   :  { %v171_v21 = vpop.f32.mrb[0].mxu0 }
 0x12d   :  { %v172_v22 = vadd.f32 %v361_v20, %v171_v21  ;;  %v414_v23 = vpop.f32.mrb[1].mxu0 }
 0x12e   :  { %v174_v24 = vpop.f32.mrb[2].mxu0 }
 0x12f   :  { %v180_v25 = vmul.f32 0.70710677, %v172_v22  ;;  %v175_v26 = vadd.f32 %v361_v20, %v174_v24  ;;  %v415_v27 = vpop.f32.mrb[3].mxu0  ;;  %v178_v32 = vmul.f32 0.5, %v172_v22 }
 0x131   :  { %462 = verf.f32 %v180_v25  ;;  %v181_v28 = vmul.f32 0.70710677, %v175_v26  ;;  %v179_v33 = vmul.f32 0.5, %v175_v26 }
 0x133   :  { %464 = verf.f32 %v181_v28 }
 0x13b   :  { %v463_v29 = vpop.eup %462 }
 0x13c   :  { %v184_v30 = vadd.f32 1.0, %v463_v29 }
 0x13d   :  { %v465_v31 = vpop.eup %464 }
 0x13e   :  { %v185_v34 = vadd.f32 1.0, %v465_v31  ;;  %v186_v35 = vmul.f32 %v184_v30, %v178_v32 }
 0x140   :  { %v187_v36 = vmul.f32 %v185_v34, %v179_v33 }
 0x142   :  { %v188_v37 = vpack.c.bf16 %v187_v36, %v186_v35 }
 0x144   :  { %433 = vmatmul.mubr.bf16.vlgmr.msra.gmra.mrb[0].mxu1 %v188_v37 }
 0x217   :  { %v292_v43 = vpop.f32.mrb[0].mxu1 }
 0x218   :  { %v293_v44 = vadd.f32 %v292_v43, %v209_v42  ;;  %v434_v45 = vpop.f32.mrb[1].mxu1 }
 0x219   :  { %v295_v46 = vpop.f32.mrb[2].mxu1 }
 0x21a   :  { %299 = vadd.xlane.f32.xlu0 %v293_v44  ;;  %v435_v47 = vpop.f32.mrb[3].mxu1  ;;  %v296_v48 = vadd.f32 %v295_v46, %v209_v42 }
 0x21e   :  { %301 = vadd.xlane.f32.xlu0 %v296_v48 }
 0x2a7   :  { %v300_v49 = vpop.xlane.xlu0 %299 }
 0x2a8   :  { %v303_v50 = vmul.f32 0.03125, %v300_v49 }
 0x2aa   :  { %v305_v51 = vsub.f32 %v293_v44, %v303_v50  ;;  %v313_v57 = vmul.f32 96.0, %v303_v50 }
 0x2ab   :  { %v302_v52 = vpop.xlane.xlu0 %301 }
 0x2ac   :  { %v304_v53 = vmul.f32 0.03125, %v302_v52  ;;  %v307_v54 = vmul.f32 %v305_v51, %v305_v51  ;;  %v315_v59 = vmul.f32 %v313_v57, %v303_v50 }
 0x2ae   :  { %309 = vadd.xlane.f32.xlu1 %v307_v54  ;;  %v306_v55 = vsub.f32 %v296_v48, %v304_v53  ;;  %v314_v58 = vmul.f32 96.0, %v304_v53 }
 0x2b0   :  { %v308_v56 = vmul.f32 %v306_v55, %v306_v55  ;;  %v316_v63 = vmul.f32 %v314_v58, %v304_v53 }
 0x2b2   :  { %311 = vadd.xlane.f32.xlu1 %v308_v56 }
 0x33b   :  { %v310_v60 = vpop.xlane.xlu1 %309 }
 0x33c   :  { %v317_v61 = vsub.f32 %v310_v60, %v315_v59 }
 0x33e   :  { %v319_v62 = vmul.f32 0.03125, %v317_v61 }
 0x33f   :  { %v312_v0 = vpop.xlane.xlu1 %311 }
 0x340   :  { %v321_v1 = vadd.f32 1e-05, %v319_v62  ;;  %v318_v2 = vsub.f32 %v312_v0, %v316_v63 }
 0x342   :  { %466 = vrsqrt.f32 %v321_v1  ;;  %v320_v3 = vmul.f32 0.03125, %v318_v2 }
 0x344   :  { %v322_v4 = vadd.f32 1e-05, %v320_v3 }
 0x346   :  { %468 = vrsqrt.f32 %v322_v4 }
 0x34c   :  { %v467_v8 = vpop.eup %466 }
 0x34d   :  { %v325_v10 = vmul.f32 %v467_v8, %v305_v51 }
 0x34f   :  { %v331_v13 = vmul.f32 %v330_v7, %v325_v10 }
 0x350   :  { %v469_v14 = vpop.eup %468 }
 0x351   :  { %v326_v15 = vmul.f32 %v469_v14, %v306_v55  ;;  %v337_v16 = vadd.f32 %v336_v9, %v331_v13 }
 0x353   :  { %v332_v17 = vmul.f32 %v330_v7, %v326_v15  ;;  %v339_v18 = vadd.f32 %v337_v16, %v649_v11 }
 0x355   :  { %v338_v19 = vadd.f32 %v336_v9, %v332_v17  ;;  %341 = vst [vmem:[#allocation8] sm:$0xff] %v339_v18 }
 0x357   :  { %v340_v20 = vadd.f32 %v338_v19, %v651_v12 }
 0x359   :  { %342 = vst [vmem:[#allocation8 + $0x8] sm:$0xff] %v340_v20 }
 0x35a   :  { %547 = shalt.err (!%p544_p0)
}
 0x35b   :  { %s548_s12 = scalar_lea.hbm %s683_s5, 256 }
 0x35c   :  { %p549_p1 = scmp.ne.s32.totalorder %s683_s5, %s548_s12  ;;  %p552_p2 = scmp.lt.u32.totalorder %s548_s12, %s683_s5 }
 0x35e   :  { %p554_p3 = pnand %p552_p2, %p549_p1 }
 0x360   :  { %557 = shalt.err (!%p554_p3)
}
 0x361   :  { %354 = dma.vmem_to_hbm [thread:$0]  %s349_s8, 256, %s683_s5, [#allocation4], %s568_s1, %s568_s1, %s569_s17  }
 0x362   :  { %562 = dma.done.wait [#allocation4], 256  }
 0x363   :  { %563 = vsyncadd [#allocation4], 4294967040 }
 0x364   :  { %358 = vsyncpa [#allocation3], 1 }
 0x365   :  { %359 = vsyncpa [#allocation6], 1 }
 0x366   :  { %360 = vsyncpa [#allocation4], 1 }

</bundles_post_ra>
